<compile_context>
chip_gen: v7x
topology: tpu7x:2x2x1
jax: 0.10.0
libtpu: 0.0.40
codegen_flags: <defaults>
</compile_context>

<pallas_src>
import functools
import numpy as np
import jax
import jax.numpy as jnp
from jax.experimental import pallas as pl
from jax.experimental.pallas import tpu as pltpu


def _round_up(x, m):
    return ((x + m - 1) // m) * m


def _cdiv(a, b):
    return -(-a // b)


# ---------------------------------------------------------------------------
# Deterministic parameter construction (mirrors PytorchSTFT / PytorchMelSTFT)
# ---------------------------------------------------------------------------
def _hann_periodic(win_len):
    # scipy.signal.get_window('hann', Nx) with default fftbins=True (periodic)
    n = np.arange(win_len)
    return 0.5 - 0.5 * np.cos(2.0 * np.pi * n / win_len)


def _pad_center(data, size):
    # librosa.util.pad_center
    n = len(data)
    lpad = (size - n) // 2
    rpad = size - n - lpad
    return np.pad(data, (lpad, rpad), mode="constant")


def _fourier_basis(n_fft, win_len):
    """Windowed Fourier basis split into real / imag parts.

    Returns (basis_re, basis_im), each (n_fft, cutoff) so that
    frames @ basis_re gives the real part of the STFT (and similarly imag).
    """
    cutoff = n_fft // 2 + 1
    fft_basis = np.fft.fft(np.eye(n_fft))              # (n_fft, n_fft) complex
    re = np.real(fft_basis[:cutoff, :])                 # (cutoff, n_fft)
    im = np.imag(fft_basis[:cutoff, :])                 # (cutoff, n_fft)
    win = _pad_center(_hann_periodic(win_len), n_fft).astype(np.float32)
    re = (re * win[None, :]).astype(np.float32)
    im = (im * win[None, :]).astype(np.float32)
    return re.T.copy(), im.T.copy()                     # (n_fft, cutoff) each


def _hz_to_mel(f):
    # librosa Slaney scale (htk=False)
    f = np.asarray(f, dtype=np.float64)
    f_sp = 200.0 / 3
    mels = f / f_sp
    min_log_hz = 1000.0
    min_log_mel = min_log_hz / f_sp
    logstep = np.log(6.4) / 27.0
    log_region = f >= min_log_hz
    mels = np.where(log_region,
                    min_log_mel + np.log(np.maximum(f, 1e-10) / min_log_hz) / logstep,
                    mels)
    return mels


def _mel_to_hz(m):
    m = np.asarray(m, dtype=np.float64)
    f_sp = 200.0 / 3
    freqs = m * f_sp
    min_log_hz = 1000.0
    min_log_mel = min_log_hz / f_sp
    logstep = np.log(6.4) / 27.0
    log_region = m >= min_log_mel
    freqs = np.where(log_region,
                     min_log_hz * np.exp(logstep * (m - min_log_mel)),
                     freqs)
    return freqs


def _mel_filterbank(sr, n_fft, n_mels, fmin, fmax):
    """librosa.filters.mel(htk=False, norm='slaney') equivalent.

    Returns (cutoff, n_mels) so the kernel can do mag(M, cutoff) @ mel.
    """
    cutoff = n_fft // 2 + 1
    fftfreqs = np.linspace(0.0, sr / 2.0, cutoff)
    mel_pts = np.linspace(_hz_to_mel(fmin), _hz_to_mel(fmax), n_mels + 2)
    mel_f = _mel_to_hz(mel_pts)                          # (n_mels+2,)
    fdiff = np.diff(mel_f)
    ramps = mel_f[:, None] - fftfreqs[None, :]           # (n_mels+2, cutoff)
    lower = -ramps[:-2] / fdiff[:-1, None]
    upper = ramps[2:] / fdiff[1:, None]
    weights = np.maximum(0.0, np.minimum(lower, upper))  # (n_mels, cutoff)
    enorm = 2.0 / (mel_f[2: n_mels + 2] - mel_f[:n_mels])
    weights = weights * enorm[:, None]
    return weights.astype(np.float32).T.copy()           # (cutoff, n_mels)


# ---------------------------------------------------------------------------
# Pallas kernel: fused STFT matmul + magnitude + mel projection + log-clamp
# ---------------------------------------------------------------------------
def _melstft_kernel(frames_ref, basis_ref, mel_ref, out_ref, *, cutoff_p, precision):
    # (TM, n_fft) @ (n_fft, 2*Cp): single wide MXU matmul, f32 accumulation.
    ri = jnp.dot(frames_ref[...], basis_ref[...],
                 preferred_element_type=jnp.float32, precision=precision)
    # Slice into lane-aligned halves BEFORE squaring (Cp is a multiple of 128);
    # avoids a full-width (TM, 2*Cp) squared temporary.
    re = ri[:, :cutoff_p]
    im = ri[:, cutoff_p:]
    mag = jnp.sqrt(re * re + im * im)                               # (TM, Cp) f32
    mel_out = jnp.dot(mag, mel_ref[...],
                      preferred_element_type=jnp.float32, precision=precision)
    out_ref[...] = jnp.log(jnp.maximum(mel_out, 1e-5))


def _melstft_pallas(frames, basis_ri, mel_p, *, tile_m, precision,
                    single_buffer_weights, vmem_limit_bytes):
    Mp, n_fft = frames.shape
    c2p = basis_ri.shape[1]
    cp = c2p // 2
    nmels_p = mel_p.shape[1]
    grid_m = Mp // tile_m

    # Weights use a constant block index (resident in VMEM).  Single-buffer
    # them when supported: the default 2nd pipeline buffer is pure VMEM waste.
    wkw = dict(pipeline_mode=pl.Buffered(1)) if single_buffer_weights else {}

    flops = int(2 * Mp * n_fft * c2p + 2 * Mp * cp * nmels_p)
    transcendentals = int(Mp * (cp + nmels_p))            # sqrt + log
    bytes_accessed = int(frames.dtype.itemsize * Mp * n_fft
                         + basis_ri.dtype.itemsize * n_fft * c2p
                         + 4 * (Mp * nmels_p + cp * nmels_p))

    kernel = functools.partial(_melstft_kernel, cutoff_p=cp, precision=precision)
    return pl.pallas_call(
        kernel,
        out_shape=jax.ShapeDtypeStruct((Mp, nmels_p), jnp.float32),
        grid_spec=pltpu.PrefetchScalarGridSpec(
            num_scalar_prefetch=0,
            grid=(grid_m,),
            in_specs=[
                # frames: tiled over M, double-buffered by the pipeline
                pl.BlockSpec((tile_m, n_fft), lambda i: (i, 0)),
                # weights: constant block index -> fetched once, stay resident
                pl.BlockSpec((n_fft, c2p), lambda i: (0, 0), **wkw),
                pl.BlockSpec((cp, nmels_p), lambda i: (0, 0), **wkw),
            ],
            out_specs=pl.BlockSpec((tile_m, nmels_p), lambda i: (i, 0)),
        ),
        compiler_params=pltpu.CompilerParams(
            # frame tiles are independent -> shard across TCs on v7x megacore
            dimension_semantics=("parallel",),
            vmem_limit_bytes=int(vmem_limit_bytes),
        ),
        cost_estimate=pl.CostEstimate(
            flops=flops,
            transcendentals=transcendentals,
            bytes_accessed=bytes_accessed,
        ),
    )(frames, basis_ri, mel_p)


# ---------------------------------------------------------------------------
# Module-equivalent wrapper
# ---------------------------------------------------------------------------
class MelSTFT:
    def __init__(self, sr, n_fft, fmin, fmax, hop_len, win_len, n_mels=80,
                 use_bf16=False, precision=None):
        assert n_fft >= win_len
        self.n_fft = int(n_fft)
        self.hop_len = int(hop_len)
        self.win_len = int(win_len)
        self.n_mels = int(n_mels)
        self.cutoff = self.n_fft // 2 + 1
        # Optional bf16 inputs for the big matmul (f32 accumulation everywhere);
        # f32 by default to match the PyTorch reference numerics.
        self.use_bf16 = bool(use_bf16)
        self.compute_dtype = jnp.bfloat16 if use_bf16 else jnp.float32
        self._in_itemsize = 2 if use_bf16 else 4
        self._row_align = 16 if use_bf16 else 8
        self.precision = precision            # e.g. jax.lax.Precision.HIGHEST
        self._single_buffer_weights = None    # resolved lazily on first call

        # --- mel filterbank + dead-bin trimming -------------------------------
        # Bins with all-zero mel weights (below fmin / above fmax, incl. the
        # Nyquist bin) contribute nothing to the output; drop them before
        # padding so the fused basis carries no dead MXU columns.
        mel_full = _mel_filterbank(sr, self.n_fft, self.n_mels, fmin, fmax)  # (cutoff, n_mels)
        active = np.flatnonzero(np.any(mel_full > 0.0, axis=1))
        if active.size == 0:
            first, last = 0, self.cutoff - 1
        else:
            first, last = int(active[0]), int(active[-1])
        self.bin_lo = first
        self.cutoff_eff = last - first + 1
        # lane-dense padded dims (multiples of 128)
        self.cutoff_p = _round_up(self.cutoff_eff, 128)
        self.n_mels_p = _round_up(self.n_mels, 128)

        bre, bim = _fourier_basis(self.n_fft, self.win_len)      # (n_fft, cutoff)
        basis_ri = np.zeros((self.n_fft, 2 * self.cutoff_p), np.float32)
        basis_ri[:, :self.cutoff_eff] = bre[:, first:last + 1]
        basis_ri[:, self.cutoff_p:self.cutoff_p + self.cutoff_eff] = bim[:, first:last + 1]
        self.basis_ri = jnp.asarray(basis_ri, dtype=self.compute_dtype)  # (n_fft, 2*Cp)

        mel_p = np.zeros((self.cutoff_p, self.n_mels_p), np.float32)
        mel_p[:self.cutoff_eff, :self.n_mels] = mel_full[first:last + 1, :]
        self.mel_p = jnp.asarray(mel_p)            # mel projection stays f32

        # --- generation-aware VMEM budget / max tile --------------------------
        try:
            self.vmem_cap = int(pltpu.get_tpu_info().vmem_capacity_bytes)
        except Exception:
            self.vmem_cap = 64 * 1024 * 1024       # conservative: v7x per-TC VMEM
        # bigger tiles on 128 MiB parts (v5e/v6e), 512 on v7x (64 MiB)
        self.tile_m_max = 1024 if self.vmem_cap >= 96 * 1024 * 1024 else 512

    # ------------------------------------------------------------------ VMEM
    def _vmem_need_bytes(self, tm, weight_bufs=2):
        frames_b = 2 * tm * self.n_fft * self._in_itemsize       # dbl-buffered in tile
        out_b = 2 * tm * self.n_mels_p * 4                       # dbl-buffered out tile
        w_b = weight_bufs * (self.n_fft * 2 * self.cutoff_p * self._in_itemsize
                             + self.cutoff_p * self.n_mels_p * 4)
        interm_b = 3 * tm * 2 * self.cutoff_p * 4                # ri / squares / mag (f32)
        return frames_b + out_b + w_b + interm_b

    def _plan_tiles(self, M):
        """Pick tile_m so the last tile is mostly full, grid >= 2 when M allows,
        and the VMEM footprint fits the per-generation budget."""
        budget = int(self.vmem_cap * 0.7)
        min_tiles = min(4, max(1, M // self._row_align))
        n_tiles = max(_cdiv(M, self.tile_m_max), min_tiles)
        tm = _round_up(_cdiv(M, n_tiles), self._row_align)
        while self._vmem_need_bytes(tm) > budget and tm > self._row_align:
            tm = _round_up(max(self._row_align, tm // 2), self._row_align)
        Mp = _round_up(M, tm)
        # conservative (double-buffered-weights) need + headroom, never below the
        # default scoped limit, never above ~90% of physical VMEM
        vmem_limit = self._vmem_need_bytes(tm) * 5 // 4 + (2 << 20)
        vmem_limit = max(vmem_limit, 32 << 20)
        vmem_limit = min(vmem_limit, int(self.vmem_cap * 0.9))
        return tm, Mp, vmem_limit

    # ---------------------------------------------------------------- kernel
    def _run_kernel(self, frames, tm, vmem_limit):
        kwargs = dict(tile_m=tm, precision=self.precision,
                      vmem_limit_bytes=vmem_limit)
        if self._single_buffer_weights is None:
            try:
                out = _melstft_pallas(frames, self.basis_ri, self.mel_p,
                                      single_buffer_weights=True, **kwargs)
                jax.block_until_ready(out)
                self._single_buffer_weights = True
                return out
            except Exception:
                # This jax build rejects pl.Buffered(1) on an auto-pipelined
                # operand; fall back to default double-buffered weights
                # (VMEM-footprint-only difference, numerics identical).
                self._single_buffer_weights = False
        return _melstft_pallas(frames, self.basis_ri, self.mel_p,
                               single_buffer_weights=self._single_buffer_weights,
                               **kwargs)

    # --------------------------------------------------------------- forward
    def __call__(self, x):
        """x: (B, L) float32 in [-1, 1]  ->  (B, n_mels, T) float32."""
        B, L = x.shape
        pad = self.n_fft // 2
        if L <= pad:
            raise ValueError("reflect padding requires timestamps > n_fft // 2")
        xp = jnp.pad(x, ((0, 0), (pad, pad)), mode="reflect")       # (B, L + 2*pad)
        Lp = L + 2 * pad
        n_frames = 1 + (Lp - self.n_fft) // self.hop_len

        if self.n_fft % self.hop_len == 0:
            # Gather-free framing: n_fft/hop_len hop-strided slices + concat.
            k = self.n_fft // self.hop_len
            span = n_frames * self.hop_len
            segs = [
                xp[:, r * self.hop_len: r * self.hop_len + span]
                .reshape(B, n_frames, self.hop_len)
                for r in range(k)
            ]
            frames = jnp.concatenate(segs, axis=-1)                  # (B, T, n_fft)
        else:
            # TODO(synk): in-kernel framing (DMA the contiguous signal span per
            # M-tile via memory_space=pl.ANY + make_async_copy, build rows with
            # pl.ds) to avoid this gather + frame duplication when hop ∤ n_fft.
            idx = (jnp.arange(n_frames)[:, None] * self.hop_len
                   + jnp.arange(self.n_fft)[None, :])
            frames = xp[:, idx]                                      # (B, T, n_fft)

        frames = frames.reshape(B * n_frames, self.n_fft).astype(self.compute_dtype)

        M = B * n_frames
        tm, Mp, vmem_limit = self._plan_tiles(M)
        if Mp != M:
            frames = jnp.pad(frames, ((0, Mp - M), (0, 0)))          # zero rows

        out = self._run_kernel(frames, tm, vmem_limit)
        out = out[:M, :self.n_mels].reshape(B, n_frames, self.n_mels)
        # (B, n_mels, T) to match the PyTorch module; consumers that accept
        # (B, T, n_mels) can skip this extra HBM transpose pass.
        return jnp.transpose(out, (0, 2, 1))


if __name__ == "__main__":
    # small deterministic config
    sr, n_fft, fmin, fmax = 16000, 64, 0.0, 8000.0
    hop_len, win_len, n_mels = 16, 64, 16
    batch, timestamps = 2, 256

    key = jax.random.PRNGKey(0)
    x = jax.random.uniform(key, (batch, timestamps),
                           minval=-1.0, maxval=1.0, dtype=jnp.float32)

    model = MelSTFT(sr, n_fft, fmin, fmax, hop_len, win_len, n_mels)
    y = model(x)
    jax.block_until_ready(y)

    expected_T = 1 + (timestamps + 2 * (n_fft // 2) - n_fft) // hop_len
    assert y.shape == (batch, n_mels, expected_T), y.shape
    assert y.dtype == jnp.float32
    assert bool(jnp.all(jnp.isfinite(y)))

    # Numpy float64 reference (same math as the PyTorch module) for a tolerance
    # check; loose atol covers the MXU's default (reduced-precision) f32 matmul.
    xn = np.asarray(x, dtype=np.float64)
    pad = n_fft // 2
    xpad = np.pad(xn, ((0, 0), (pad, pad)), mode="reflect")
    fr = np.stack([xpad[:, t * hop_len: t * hop_len + n_fft]
                   for t in range(expected_T)], axis=1)              # (B, T, n_fft)
    bre, bim = _fourier_basis(n_fft, win_len)
    re = fr @ bre.astype(np.float64)
    im = fr @ bim.astype(np.float64)
    mag = np.sqrt(re ** 2 + im ** 2)                                  # (B, T, cutoff)
    melw = _mel_filterbank(sr, n_fft, n_mels, fmin, fmax).astype(np.float64)
    ref = np.log(np.maximum(mag @ melw, 1e-5)).transpose(0, 2, 1)     # (B, n_mels, T)
    np.testing.assert_allclose(np.asarray(y, dtype=np.float64), ref, atol=1e-1, rtol=0)

    print("KERNEL_OK")
</pallas_src>

<mosaic_0001>
module attributes {stable_mosaic.version = 11 : i64} {
  func.func @_melstft_kernel(%arg0: i32, %arg1: memref<16x64xf32, #tpu.memory_space<vmem>>, %arg2: memref<64x256xf32, #tpu.memory_space<vmem>>, %arg3: memref<128x128xf32, #tpu.memory_space<vmem>>, %arg4: memref<16x128xf32, #tpu.memory_space<vmem>>) attributes {dimension_semantics = [#tpu.dimension_semantics<parallel>], iteration_bounds = array<i64: 3>, scalar_prefetch = 0 : i64, scratch_operands = 0 : i64, tpu.core_type = #tpu.core_type<tc>, window_params = [{transform_indices = @transform_0, window_bounds = array<i64: 16, 64>}, {pipeline_mode = #tpu.pipeline_mode<synchronous>, transform_indices = @transform_1, window_bounds = array<i64: 64, 256>}, {pipeline_mode = #tpu.pipeline_mode<synchronous>, transform_indices = @transform_2, window_bounds = array<i64: 128, 128>}, {transform_indices = @transform_3, window_bounds = array<i64: 16, 128>}]} {
    %c0 = arith.constant 0 : index
    %c0_0 = arith.constant 0 : index
    %0 = vector.load %arg1[%c0, %c0_0] : memref<16x64xf32, #tpu.memory_space<vmem>>, vector<16x64xf32>
    %c0_1 = arith.constant 0 : index
    %c0_2 = arith.constant 0 : index
    %1 = vector.load %arg2[%c0_1, %c0_2] : memref<64x256xf32, #tpu.memory_space<vmem>>, vector<64x256xf32>
    %cst = arith.constant dense<0.000000e+00> : vector<16x256xf32>
    %2 = tpu.matmul %0, %1, %cst {dimension_numbers = #tpu.dot_dimension_numbers<[1], [0], [0], [1], [0, 0, 1, 1], [], []>} : vector<16x64xf32>, vector<64x256xf32>, vector<16x256xf32> -> vector<16x256xf32>
    %3 = vector.extract_strided_slice %2 {offsets = [0, 0], sizes = [16, 128], strides = [1, 1]} : vector<16x256xf32> to vector<16x128xf32>
    %4 = vector.extract_strided_slice %2 {offsets = [0, 128], sizes = [16, 128], strides = [1, 1]} : vector<16x256xf32> to vector<16x128xf32>
    %5 = arith.mulf %3, %3 : vector<16x128xf32>
    %6 = arith.mulf %4, %4 : vector<16x128xf32>
    %7 = arith.addf %5, %6 : vector<16x128xf32>
    %8 = math.sqrt %7 : vector<16x128xf32>
    %c0_3 = arith.constant 0 : index
    %c0_4 = arith.constant 0 : index
    %9 = vector.load %arg3[%c0_3, %c0_4] : memref<128x128xf32, #tpu.memory_space<vmem>>, vector<128x128xf32>
    %cst_5 = arith.constant dense<0.000000e+00> : vector<16x128xf32>
    %10 = tpu.matmul %8, %9, %cst_5 {dimension_numbers = #tpu.dot_dimension_numbers<[1], [0], [0], [1], [0, 0, 1, 1], [], []>} : vector<16x128xf32>, vector<128x128xf32>, vector<16x128xf32> -> vector<16x128xf32>
    %cst_6 = arith.constant 9.99999974E-6 : f32
    %11 = vector.broadcast %cst_6 : f32 to vector<16x128xf32>
    %12 = arith.maximumf %10, %11 : vector<16x128xf32>
    %13 = math.log %12 : vector<16x128xf32>
    %c0_7 = arith.constant 0 : index
    %c0_8 = arith.constant 0 : index
    %14 = vector.load %arg4[%c0_7, %c0_8] : memref<16x128xf32, #tpu.memory_space<vmem>>, vector<16x128xf32>
    tpu.vector_store %arg4[%c0_7, %c0_8], %13 {strides = array<i32>} : memref<16x128xf32, #tpu.memory_space<vmem>>, vector<16x128xf32>,
    return
  }
  func.func @transform_0(%arg0: i32) -> (i32, i32) {
    %c0_i32 = arith.constant 0 : i32
    %c0_i32_0 = arith.constant 0 : i32
    return %arg0, %c0_i32 : i32, i32
  }
  func.func @transform_1(%arg0: i32) -> (i32, i32) {
    %c0_i32 = arith.constant 0 : i32
    %c0_i32_0 = arith.constant 0 : i32
    %c0_i32_1 = arith.constant 0 : i32
    return %c0_i32, %c0_i32_0 : i32, i32
  }
  func.func @transform_2(%arg0: i32) -> (i32, i32) {
    %c0_i32 = arith.constant 0 : i32
    %c0_i32_0 = arith.constant 0 : i32
    %c0_i32_1 = arith.constant 0 : i32
    return %c0_i32, %c0_i32_0 : i32, i32
  }
  func.func @transform_3(%arg0: i32) -> (i32, i32) {
    %c0_i32 = arith.constant 0 : i32
    %c0_i32_0 = arith.constant 0 : i32
    return %arg0, %c0_i32 : i32, i32
  }
}

module attributes {stable_mosaic.version = 11 : i64} {
  func.func @_melstft_kernel(%arg0: i32, %arg1: memref<16x64xf32, #tpu.memory_space<vmem>>, %arg2: memref<64x256xf32, #tpu.memory_space<vmem>>, %arg3: memref<128x128xf32, #tpu.memory_space<vmem>>, %arg4: memref<16x128xf32, #tpu.memory_space<vmem>>) attributes {dimension_semantics = [#tpu.dimension_semantics<parallel>], iteration_bounds = array<i64: 3>, scalar_prefetch = 0 : i64, scratch_operands = 0 : i64, tpu.core_type = #tpu.core_type<tc>, window_params = [{transform_indices = @transform_0, window_bounds = array<i64: 16, 64>}, {pipeline_mode = #tpu.pipeline_mode<synchronous>, transform_indices = @transform_1, window_bounds = array<i64: 64, 256>}, {pipeline_mode = #tpu.pipeline_mode<synchronous>, transform_indices = @transform_2, window_bounds = array<i64: 128, 128>}, {transform_indices = @transform_3, window_bounds = array<i64: 16, 128>}]} {
    %c0 = arith.constant 0 : index
    %c0_0 = arith.constant 0 : index
    %0 = vector.load %arg1[%c0, %c0_0] : memref<16x64xf32, #tpu.memory_space<vmem>>, vector<16x64xf32>
    %c0_1 = arith.constant 0 : index
    %c0_2 = arith.constant 0 : index
    %1 = vector.load %arg2[%c0_1, %c0_2] : memref<64x256xf32, #tpu.memory_space<vmem>>, vector<64x256xf32>
    %cst = arith.constant dense<0.000000e+00> : vector<16x256xf32>
    %2 = tpu.matmul %0, %1, %cst {dimension_numbers = #tpu.dot_dimension_numbers<[1], [0], [0], [1], [0, 0, 1, 1], [], []>} : vector<16x64xf32>, vector<64x256xf32>, vector<16x256xf32> -> vector<16x256xf32>
    %3 = vector.extract_strided_slice %2 {offsets = [0, 0], sizes = [16, 128], strides = [1, 1]} : vector<16x256xf32> to vector<16x128xf32>
    %4 = vector.extract_strided_slice %2 {offsets = [0, 128], sizes = [16, 128], strides = [1, 1]} : vector<16x256xf32> to vector<16x128xf32>
    %5 = arith.mulf %3, %3 : vector<16x128xf32>
    %6 = arith.mulf %4, %4 : vector<16x128xf32>
    %7 = arith.addf %5, %6 : vector<16x128xf32>
    %8 = math.sqrt %7 : vector<16x128xf32>
    %c0_3 = arith.constant 0 : index
    %c0_4 = arith.constant 0 : index
    %9 = vector.load %arg3[%c0_3, %c0_4] : memref<128x128xf32, #tpu.memory_space<vmem>>, vector<128x128xf32>
    %cst_5 = arith.constant dense<0.000000e+00> : vector<16x128xf32>
    %10 = tpu.matmul %8, %9, %cst_5 {dimension_numbers = #tpu.dot_dimension_numbers<[1], [0], [0], [1], [0, 0, 1, 1], [], []>} : vector<16x128xf32>, vector<128x128xf32>, vector<16x128xf32> -> vector<16x128xf32>
    %cst_6 = arith.constant 9.99999974E-6 : f32
    %11 = vector.broadcast %cst_6 : f32 to vector<16x128xf32>
    %12 = arith.maximumf %10, %11 : vector<16x128xf32>
    %13 = math.log %12 : vector<16x128xf32>
    %c0_7 = arith.constant 0 : index
    %c0_8 = arith.constant 0 : index
    %14 = vector.load %arg4[%c0_7, %c0_8] : memref<16x128xf32, #tpu.memory_space<vmem>>, vector<16x128xf32>
    tpu.vector_store %arg4[%c0_7, %c0_8], %13 {strides = array<i32>} : memref<16x128xf32, #tpu.memory_space<vmem>>, vector<16x128xf32>,
    return
  }
  func.func @transform_0(%arg0: i32) -> (i32, i32) {
    %c0_i32 = arith.constant 0 : i32
    %c0_i32_0 = arith.constant 0 : i32
    return %arg0, %c0_i32 : i32, i32
  }
  func.func @transform_1(%arg0: i32) -> (i32, i32) {
    %c0_i32 = arith.constant 0 : i32
    %c0_i32_0 = arith.constant 0 : i32
    %c0_i32_1 = arith.constant 0 : i32
    return %c0_i32, %c0_i32_0 : i32, i32
  }
  func.func @transform_2(%arg0: i32) -> (i32, i32) {
    %c0_i32 = arith.constant 0 : i32
    %c0_i32_0 = arith.constant 0 : i32
    %c0_i32_1 = arith.constant 0 : i32
    return %c0_i32, %c0_i32_0 : i32, i32
  }
  func.func @transform_3(%arg0: i32) -> (i32, i32) {
    %c0_i32 = arith.constant 0 : i32
    %c0_i32_0 = arith.constant 0 : i32
    return %arg0, %c0_i32 : i32, i32
  }
}

</mosaic_0001>

<bundles_post_ra>
// kernel: tpu_custom_call.1
= control target key start
LH: loop header
LB: loop body
LE: loop exit
PB: predicated region body
PF: predicated region fallthrough
CT: control target
= control target key end

     0   :  { %8 = vsyncpa [#allocation3], 0  ;;  %s1180_s0 = inlined_call_operand.hbm [shape: f32[48,64], index: 0, kind: input, shape index: {}]   ;;  %s1181_s1 = inlined_call_operand.hbm [shape: f32[64,256], index: 1, kind: input, shape index: {}]   ;;  %s1182_s2 = inlined_call_operand.hbm [shape: f32[128,128], index: 2, kind: input, shape index: {}]   ;;  %s1183_s3 = inlined_call_operand.hbm [shape: f32[48,128], index: 3, kind: output, shape index: {}]  }
   0x1   :  { %10 = vsyncpa [#allocation3 + $0x1], 0 }
   0x2   :  { %11 = vsyncpa [#allocation6], 0 }
   0x3   :  { %12 = vsyncpa [#allocation4], 0 }
   0x4   :  { %14 = vsyncpa [#allocation4 + $0x1], 0  ;;  %s941_s12 = smov 0   ;;  %s943_s13 = smov 0  }
   0x5   :  { %s945_s14 = smov 0   ;;  %s947_s15 = smov 0  }
   0x6 LB: > { %s962_s16 = sadd.s32 4294967295, %s908_s15   ;;  %s547_s17 = sadd.s32 4294967294, %s908_s15   ;;  %s908_s15 = sphi %s947_s15, %s1202_s15   ;;  %s904_s14 = sphi %s945_s14, %s1201_s14   ;;  %s900_s13 = sphi %s943_s13, %s1200_s13   ;;  %s896_s12 = sphi %s941_s12, %s1199_s12  }
   0x7   : > { %p40_p0 = scmp.ne.s32.totalorder %s900_s13, %s896_s12  ;;  %p1184_p1 = scmp.eq.s32.totalorder %s962_s16, 0 }
   0x8   : > { %p112_p3 = scmp.eq.s32.totalorder %s547_s17, 2  ;;  %p548_p5 = scmp.ge.s32.totalorder %s908_s15, 1 }
   0x9   : > { %p971_p4 = por %p1184_p1, %p40_p0  ;;  %p119_p7 = scmp.lt.s32.totalorder %s908_s15, 4 }
   0xa   : > { %p976_p6 = por %p112_p3, %p40_p0  ;;  %s910_s21 = smov [#allocation5]  }
   0xb   : > { %s1187_s18 = scalar_select %p971_p4, 1, 0 }
   0xc   : > { %s1188_s19 = scalar_select %p976_p6, 1, 0 }
   0xd   : > { %p981_p8 = pnand %p548_p5, %p119_p7  ;;  %s131_s22 = sshll.u32 %s910_s21, 4  ;;  %s132_s22 = int_to_ptr.vmem [resolvable:$true] %s131_s22 }
   0xe   : > { %s911_s24 = smov [#allocation7]   ;;  %s752_s28 = scalar_lea.hbm %s1181_s1, 2048 }
   0xf   : > { %s1189_s20 = scalar_select %p981_p8, 1, 0 }
  0x10   : > { %p682_p9 = pneg %p981_p8  ;;  %s144_s25 = sshll.u32 %s911_s24, 4  ;;  %s993_s25 = int_to_ptr.vmem [resolvable:$true] %s144_s25 }
  0x11   : > { %p753_p11 = scmp.ne.s32.totalorder %s1181_s1, %s752_s28  ;;  %p759_p3 = scmp.lt.u32.totalorder %s752_s28, %s1181_s1 }
  0x12   : > { %p989_p10 = pnand %p682_p9, %p1184_p1 }
  0x14   : > { %p754_p12 = pneg %p989_p10 }
  0x16   : > { %p755_p13 = pnand %p754_p12, %p753_p11 }
  0x18   : > { %p756_p0 = pneg %p755_p13 }
  0x1a   : > { %p761_p5 = pnand %p759_p3, %p756_p0 }
  0x1c   : > { %764 = shalt.err (!%p761_p5)
}
  0x1d   : > { %s765_s6 = scalar_lea.vmem %s132_s22, 2048  ;;  %p773_p2 = scmp.lt.s32.totalorder %s132_s22, %s132_s22 }
  0x1e   : > { %p766_p7 = scmp.ne.s32.totalorder %s132_s22, %s765_s6  ;;  %p774_p6 = scmp.lt.s32.totalorder %s765_s6, %s765_s6 }
  0x20   : > { %p768_p9 = pnand %p766_p7, %p754_p12  ;;  %p775_p4 = por %p774_p6, %p773_p2 }
  0x22   : > { %p769_p1 = pneg %p768_p9 }
  0x24   : > { %p776_p8 = pnand %p775_p4, %p769_p1 }
  0x26   : > { %779 = shalt.err (!%p776_p8)
}
  0x27   : > { %s912_s7 = smov 256   ;;  %s913_s8 = smov 16  }
  0x28   : > { %685 = dma.hbm_to_vmem [thread:$0]  (!%p989_p10), %s1181_s1, 2048, %s132_s22, [#allocation6], %s912_s7, %s912_s7, %s913_s8  }
  0x29   : > { %s780_s21 = scalar_lea.hbm %s1182_s2, 2048 }
  0x2a   : > { %p781_p11 = scmp.ne.s32.totalorder %s1182_s2, %s780_s21  ;;  %p787_p4 = scmp.lt.u32.totalorder %s780_s21, %s1182_s2 }
  0x2c   : > { %p783_p1 = pnand %p781_p11, %p754_p12 }
  0x2e   : > { %p784_p2 = pneg %p783_p1 }
  0x30   : > { %p789_p6 = pnand %p787_p4, %p784_p2 }
  0x32   : > { %792 = shalt.err (!%p789_p6)
}
  0x33   : > { %s793_s22 = scalar_lea.vmem %s993_s25, 2048  ;;  %p801_p3 = scmp.lt.s32.totalorder %s993_s25, %s993_s25 }
  0x34   : > { %p794_p8 = scmp.ne.s32.totalorder %s993_s25, %s793_s22  ;;  %p802_p5 = scmp.lt.s32.totalorder %s793_s22, %s793_s22 }
  0x36   : > { %p796_p13 = pnand %p794_p8, %p754_p12  ;;  %p803_p7 = por %p802_p5, %p801_p3 }
  0x38   : > { %p797_p0 = pneg %p796_p13 }
  0x3a   : > { %p804_p9 = pnand %p803_p7, %p797_p0 }
  0x3c   : > { %807 = shalt.err (!%p804_p9)
}
  0x3d   : > { %s914_s29 = smov 128   ;;  %s915_s30 = smov 8  }
  0x3e   : > { %688 = dma.hbm_to_vmem [thread:$0]  (!%p989_p10), %s1182_s2, 2048, %s993_s25, [#allocation6], %s914_s29, %s914_s29, %s915_s30  }
  0x3f   : > { %s1046_s6 = sadd.s32 1, %s908_s15   ;;  %s27_s8 = sadd.s32 1, %s904_s14 }
  0x40   : > { %s24_s7 = ssub.s32 %s908_s15, %s1046_s6  ;;  %p34_p11 = scmp.ne.s32.totalorder %s904_s14, %s900_s13 }
  0x41   : > { %p25_p12 = scmp.eq.s32.totalorder %s24_s7, 0  ;;  %p35_p1 = scmp.eq.s32.totalorder %s908_s15, 0 }
  0x42   : > { %p1191_p4 = scmp.eq.s32.totalorder %s962_s16, 2  ;;  %p699_p8 = scmp.lt.s32.totalorder %s908_s15, 3 }
  0x43   : > { %s1055_s9 = scalar_select %p25_p12, %s904_s14, %s27_s8  }
  0x44   : > { %p36_p2 = por %p35_p1, %p34_p11  ;;  %p1059_p6 = por %p1191_p4, %p34_p11 }
  0x45   : > { %s158_s10 = sand.u32 1, %s904_s14   ;;  %s567_s25 = sshll.u32 %s908_s15, 8 }
  0x46   : > { %s552_s11 = sshll.u32 %s158_s10, 4  ;;  %s1069_s24 = scalar_lea.hbm %s1180_s0, %s567_s25 }
  0x47   : > { %s162_s26 = scalar_lea.vmem [#allocation2], %s552_s11  ;;  %p1073_p10 = pnand %p699_p8, %p36_p2 }
  0x48   : > { %s169_s27 = sshll.u32 %s162_s26, 4  ;;  %s1077_s22 = scalar_lea.sflag [#allocation3], %s158_s10  ;;  %s1071_s27 = int_to_ptr.vmem [resolvable:$true] %s169_s27 }
  0x49   : > { %s808_s4 = scalar_lea.hbm %s1069_s24, 256  ;;  %p810_p0 = pneg %p1073_p10 }
  0x4a   : > { %p809_p13 = scmp.ne.s32.totalorder %s1069_s24, %s808_s4  ;;  %s813_s8 = scalar_lea.hbm %s1180_s0, 768 }
  0x4b   : > { %p814_p7 = scmp.lt.u32.totalorder %s1069_s24, %s1180_s0  ;;  %p815_p9 = scmp.lt.u32.totalorder %s813_s8, %s808_s4 }
  0x4c   : > { %p811_p3 = pnand %p810_p0, %p809_p13  ;;  %p817_p11 = scmp.lt.u32.totalorder %s808_s4, %s1069_s24 }
  0x4d   : > { %p816_p12 = por %p815_p9, %p814_p7 }
  0x4e   : > { %p812_p5 = pneg %p811_p3 }
  0x4f   : > { %p818_p1 = por %p817_p11, %p816_p12 }
  0x51   : > { %p819_p2 = pnand %p818_p1, %p812_p5 }
  0x53   : > { %822 = shalt.err (!%p819_p2)
}
  0x54   : > { %s823_s10 = scalar_lea.vmem %s1071_s27, 256  ;;  %s916_s17 = smov [#allocation2]  }
  0x55   : > { %p824_p4 = scmp.ne.s32.totalorder %s1071_s27, %s823_s10  ;;  %s828_s21 = sshll.u32 %s916_s17, 4  ;;  %s829_s21 = int_to_ptr.vmem [resolvable:$false] %s828_s21 }
  0x56   : > { %s830_s26 = scalar_lea.vmem %s829_s21, 512  ;;  %p831_p3 = scmp.lt.s32.totalorder %s1071_s27, %s829_s21 }
  0x57   : > { %p826_p8 = pnand %p824_p4, %p810_p0  ;;  %p832_p7 = scmp.lt.s32.totalorder %s830_s26, %s823_s10 }
  0x59   : > { %p827_p13 = pneg %p826_p8  ;;  %p833_p9 = por %p832_p7, %p831_p3 }
  0x5b   : > { %p834_p12 = pnand %p833_p9, %p827_p13 }
  0x5d   : > { %837 = shalt.err (!%p834_p12)
}
  0x5e   : > { %692 = dma.hbm_to_vmem [thread:$0]  (!%p1073_p10), %s1069_s24, 256, %s1071_s27, %s1077_s22, %s914_s29, %s914_s29, %s915_s30  }
  0x5f   : > { %p1194_p0 = scmp.ne.s32.totalorder %s1189_s20, 0 }
  0x60   : > { %s1111_s4 = sand.u32 (!%p1194_p0), 1, %s900_s13   ;;  %p1195_p5 = scmp.ne.s32.totalorder (!%p1194_p0), %s1187_s18, 0 }
  0x61   : > { %181 = sbr.rel (%p1194_p0) target bundleno = 606 (0x25e), region = 32  ;;  %s556_s5 = sshll.u32 (!%p1194_p0), %s1111_s4, 4 }
  0x62   : > { %s184_s7 = scalar_lea.sflag (!%p1194_p0), [#allocation3], %s1111_s4  ;;  %s1117_s28 = scalar_lea.vmem (!%p1194_p0), [#allocation2], %s556_s5 }
  0x68   : > { %883 = dma.done.wait (%p1195_p5), %s184_s7, 256  }
  0x69   : > { %885 = vsyncadd (%p1195_p5), %s184_s7, 4294967040  ;;  %p1196_p10 = scmp.eq.s32.totalorder %s962_s16, 0 }
  0x6b   : > { %887 = dma.done.wait (%p1196_p10), [#allocation6], 4096   ;;  %p1197_p11 = pmov %p1196_p10 }
  0x6c   : > { %v917_v0 = vmov 0.0   ;;  %v223_v1 = vld [vmem:[#allocation5 + $0x8] sm:$0xff]  ;;  %v225_v2 = vld [vmem:[#allocation5 + $0x18] sm:$0xff]  ;;  %v222_v3 = vld [vmem:[#allocation5] sm:$0xff]  ;;  %vm238_vm0 = vcmask 523264   ;;  %s217_s18 = scalar_lea.vmem [#allocation8], %s556_s5 }
  0x6d   : > { %889 = vsyncadd (%p1197_p11), [#allocation6], 4294963200  ;;  %309 = vmatprep.mubr.f32.mxu0 %v917_v0  ;;  %v622_v4 = vpack.c.bf16 %v225_v2, %v223_v1  ;;  %v224_v5 = vld [vmem:[#allocation5 + $0x10] sm:$0xff]  ;;  %v227_v6 = vld [vmem:[#allocation5 + $0x28] sm:$0xff]  ;;  %s455_s20 = sshll.u32 %s217_s18, 4  ;;  %s568_s29 = sshll.u32 %s962_s16, 8  ;;  %s1132_s20 = int_to_ptr.vmem [resolvable:$true] %s455_s20 }
  0x6e   : > { %v229_v7 = vld [vmem:[#allocation5 + $0x38] sm:$0xff]  ;;  %v624_v8 = vpack.c.bf16 %v224_v5, %v222_v3  ;;  %v226_v10 = vld [vmem:[#allocation5 + $0x20] sm:$0xff]  ;;  %v228_v11 = vld [vmem:[#allocation5 + $0x30] sm:$0xff]  ;;  %s1137_s27 = scalar_lea.hbm %s1183_s3, %s568_s29  ;;  %s442_s22 = scalar_lea.sflag [#allocation4], %s1111_s4 }
  0x6f   : > { %v626_v9 = vpack.c.bf16 %v229_v7, %v227_v6  ;;  %v231_v12 = vld [vmem:[#allocation5 + $0x48] sm:$0xff]  ;;  %623 = vmatprep.subr.bf16.mxu0 %v622_v4  ;;  %v233_v13 = vld [vmem:[#allocation5 + $0x58] sm:$0xff]  ;;  %v628_v14 = vpack.c.bf16 %v228_v11, %v226_v10  ;;  %v230_v15 = vld [vmem:[#allocation5 + $0x40] sm:$0xff]  ;;  %s838_s8 = scalar_lea.vmem %s1132_s20, 256  ;;  %s918_s16 = smov [#allocation8]  }
  0x70   : > { %625 = vmatpush1.bf16.msra.mxu0 %v624_v8  ;;  %v630_v16 = vpack.c.bf16 %v233_v13, %v231_v12  ;;  %v232_v17 = vld [vmem:[#allocation5 + $0x50] sm:$0xff]  ;;  %v235_v18 = vld [vmem:[#allocation5 + $0x68] sm:$0xff]  ;;  %v237_v19 = vld [vmem:[#allocation5 + $0x78] sm:$0xff]  ;;  %p839_p1 = scmp.ne.s32.totalorder %s1132_s20, %s838_s8  ;;  %s842_s11 = sshll.u32 %s918_s16, 4  ;;  %s843_s11 = int_to_ptr.vmem [resolvable:$false] %s842_s11 }
  0x71   : > { %627 = vmatprep.subr.bf16.mxu0 %v626_v9  ;;  %v342_v20 = vld [vmem:[#allocation7] sm:$0xff]  ;;  %v343_v21 = vld [vmem:[#allocation7 + $0x8] sm:$0xff]  ;;  %v344_v22 = vld [vmem:[#allocation7 + $0x10] sm:$0xff]  ;;  %v632_v25 = vpack.c.bf16 %v232_v17, %v230_v15  ;;  %v634_v27 = vpack.c.bf16 %v237_v19, %v235_v18  ;;  %s844_s25 = scalar_lea.vmem %s843_s11, 512  ;;  %p845_p8 = scmp.lt.s32.totalorder %s1132_s20, %s843_s11 }
  0x72   : > { %v638_v23 = vpack.c.bf16 %v343_v21, %v342_v20  ;;  %v345_v24 = vld [vmem:[#allocation7 + $0x18] sm:$0xff]  ;;  %v234_v28 = vld [vmem:[#allocation5 + $0x60] sm:$0xff]  ;;  %v236_v29 = vld [vmem:[#allocation5 + $0x70] sm:$0xff]  ;;  %p840_p2 = pnand %p839_p1, %p1059_p6  ;;  %p846_p13 = scmp.lt.s32.totalorder %s844_s25, %s838_s8 }
  0x73   : > { %v642_v26 = vpack.c.bf16 %v345_v24, %v344_v22  ;;  %v636_v30 = vpack.c.bf16 %v236_v29, %v234_v28  ;;  %v220_v31 = vld [vmem:[%s1117_s28] sm:$0xff]  ;;  %v221_v32 = vld [vmem:[%s1117_s28 + $0x8] sm:$0xff] }
  0x74   : > { %629 = vmatpush1.bf16.msra.mxu0 %v628_v14  ;;  %639 = vmatprep.subr.bf16.mxu1 %v638_v23  ;;  %v346_v33 = vld [vmem:[#allocation7 + $0x20] sm:$0xff]  ;;  %v347_v34 = vld [vmem:[#allocation7 + $0x28] sm:$0xff]  ;;  %v348_v36 = vld [vmem:[#allocation7 + $0x30] sm:$0xff]  ;;  %p841_p4 = pneg %p840_p2  ;;  %p847_p3 = por %p846_p13, %p845_p8 }
  0x75   : > { %631 = vmatprep.subr.bf16.mxu0 %v630_v16  ;;  %641 = vmatpush3.bf16.msra.mxu1 %v638_v23  ;;  %v646_v35 = vpack.c.bf16 %v347_v34, %v346_v33  ;;  %v349_v37 = vld [vmem:[#allocation7 + $0x38] sm:$0xff]  ;;  %v350_v39 = vld [vmem:[#allocation7 + $0x40] sm:$0xff]  ;;  %v351_v40 = vld [vmem:[#allocation7 + $0x48] sm:$0xff] }
  0x76   : > { %643 = vmatprep.subr.bf16.mxu1 %v642_v26  ;;  %v650_v38 = vpack.c.bf16 %v349_v37, %v348_v36  ;;  %v654_v41 = vpack.c.bf16 %v351_v40, %v350_v39  ;;  %v352_v42 = vld [vmem:[#allocation7 + $0x50] sm:$0xff]  ;;  %v353_v43 = vld [vmem:[#allocation7 + $0x58] sm:$0xff]  ;;  %v354_v44 = vld [vmem:[#allocation7 + $0x60] sm:$0xff]  ;;  %p848_p7 = pnand %p847_p3, %p841_p4 }
  0x77   : > { %v658_v45 = vpack.c.bf16 %v353_v43, %v352_v42  ;;  %v355_v46 = vld [vmem:[#allocation7 + $0x68] sm:$0xff]  ;;  %v356_v48 = vld [vmem:[#allocation7 + $0x70] sm:$0xff]  ;;  %v357_v49 = vld [vmem:[#allocation7 + $0x78] sm:$0xff] }
  0x78   : > { %633 = vmatpush1.bf16.msra.mxu0 %v632_v25  ;;  %v662_v47 = vpack.c.bf16 %v355_v46, %v354_v44  ;;  %v666_v50 = vpack.c.bf16 %v357_v49, %v356_v48 }
  0x79   : > { %635 = vmatprep.subr.bf16.mxu0 %v634_v27  ;;  %645 = vmatpush3.bf16.msra.mxu1 %v642_v26 }
  0x7a   : > { %647 = vmatprep.subr.bf16.mxu1 %v646_v35 }
  0x7c   : > { %637 = vmatpush1.bf16.msra.mxu0 %v636_v30 }
  0x7d   : > { %649 = vmatpush3.bf16.msra.mxu1 %v646_v35 }
  0x7e   : > { %651 = vmatprep.subr.bf16.mxu1 %v650_v38 }
  0x7f   : > { %560 = vmatmul.mubr.msk.f32.vlgmr.msra.gmra.mrb[0].mxu0 %vm238_vm0, %v220_v31 }
  0x80   : > { %315 = vmatprep.mubr.f32.mxu0 %v917_v0 }
  0x81   : > { %653 = vmatpush3.bf16.msra.mxu1 %v650_v38 }
  0x82   : > { %655 = vmatprep.subr.bf16.mxu1 %v654_v41 }
  0x83   : > { %561 = vmatmul.mubr.msk.f32.gmra.mrb[2].mxu0 %vm238_vm0, %v221_v32 }
  0x85   : > { %657 = vmatpush3.bf16.msra.mxu1 %v654_v41 }
  0x86   : > { %659 = vmatprep.subr.bf16.mxu1 %v658_v45 }
  0x89   : > { %661 = vmatpush3.bf16.msra.mxu1 %v658_v45 }
  0x8a   : > { %663 = vmatprep.subr.bf16.mxu1 %v662_v47 }
  0x8d   : > { %665 = vmatpush3.bf16.msra.mxu1 %v662_v47 }
  0x8e   : > { %667 = vmatprep.subr.bf16.mxu1 %v666_v50 }
  0x91   : > { %669 = vmatpush3.bf16.msra.mxu1 %v666_v50 }
 0x152   : > { %v311_v51 = vpop.f32.mrb[0].mxu0 }
 0x153   : > { %v322_v52 = vmul.f32 %v311_v51, %v311_v51  ;;  %v313_v53 = vpop.f32.mrb[1].mxu0 }
 0x154   : > { %v324_v54 = vmul.f32 %v313_v53, %v313_v53 }
 0x156   : > { %v326_v55 = vadd.f32 %v324_v54, %v322_v52  ;;  %v317_v56 = vpop.f32.mrb[2].mxu0 }
 0x157   : > { %v323_v57 = vmul.f32 %v317_v56, %v317_v56  ;;  %v319_v58 = vpop.f32.mrb[3].mxu0 }
 0x158   : > { %v325_v59 = vmul.f32 %v319_v58, %v319_v58  ;;  %744 = vrsqrt.f32 %v326_v55  ;;  %vm330_vm1 = vcmp.eq.f32.partialorder %v326_v55, inf  ;;  %v333_v63 = vand.u32 2147483648, %v326_v55 }
 0x159   : > { %vm332_vm2 = vcmp.eq.f32.partialorder %v326_v55, 0.0 }
 0x15a   : > { %v327_v60 = vadd.f32 %v325_v59, %v323_v57 }
 0x15c   : > { %746 = vrsqrt.f32 %v327_v60  ;;  %vm337_vm3 = vcmp.eq.f32.partialorder %v327_v60, inf  ;;  %v340_v4 = vand.u32 2147483648, %v327_v60  ;;  %vm339_vm4 = vcmp.eq.f32.partialorder %v327_v60, 0.0 }
 0x162   : > { %v745_v61 = vpop.eup %744 }
 0x163   : > { %v329_v62 = vmul.f32 %v745_v61, %v326_v55 }
 0x165   : > { %v331_v0 = vsel %vm330_vm1, %v326_v55, %v329_v62 }
 0x166   : > { %v747_v1 = vpop.eup %746  ;;  %v334_v2 = vsel %vm332_vm2, %v333_v63, %v331_v0 }
 0x167   : > { %619 = vmatprep.mubr.f32.mxu1 %v334_v2  ;;  %v336_v3 = vmul.f32 %v747_v1, %v327_v60 }
 0x169   : > { %v338_v5 = vsel %vm337_vm3, %v327_v60, %v336_v3 }
 0x16a   : > { %v341_v6 = vsel %vm339_vm4, %v340_v4, %v338_v5 }
 0x16b   : > { %620 = vmatmul.mubr.f32.vlgmr.msra.gmra.mrb[0].mxu1 %v341_v6 }
 0x23e   : > { %v621_v7 = vpop.f32.mrb[0].mxu1 }
 0x23f   : > { %v434_v8 = vmax.f32 %v621_v7, 1e-05  ;;  %v424_v9 = vpop.f32.mrb[1].mxu1 }
 0x240   : > { %v433_v10 = vmax.f32 %v424_v9, 1e-05 }
 0x241   : > { %748 = vlog2.f32 %v434_v8 }
 0x242   : > { %750 = vlog2.f32 %v433_v10 }
 0x24b   : > { %v749_v11 = vpop.eup %748 }
 0x24c   : > { %v751_v12 = vpop.eup %750  ;;  %v438_v13 = vmul.f32 0.6931472, %v749_v11 }
 0x24d   : > { %v436_v14 = vmul.f32 0.6931472, %v751_v12 }
 0x24e   : > { %440 = vst [vmem:[%s217_s18 + $0x8] sm:$0xff] %v438_v13 }
 0x24f   : > { %439 = vst [vmem:[%s217_s18] sm:$0xff] %v436_v14 }
 0x250   : > { %851 = shalt.err (!%p848_p7)
}
 0x251   : > { %s852_s10 = scalar_lea.hbm %s1137_s27, 256  ;;  %s856_s26 = scalar_lea.hbm %s1183_s3, 768 }
 0x252   : > { %p853_p9 = scmp.ne.s32.totalorder %s1137_s27, %s852_s10  ;;  %p857_p5 = scmp.lt.u32.totalorder %s1137_s27, %s1183_s3 }
 0x253   : > { %p858_p10 = scmp.lt.u32.totalorder %s856_s26, %s852_s10  ;;  %p860_p1 = scmp.lt.u32.totalorder %s852_s10, %s1137_s27 }
 0x254   : > { %p854_p12 = pnand %p853_p9, %p1059_p6 }
 0x255   : > { %p859_p11 = por %p858_p10, %p857_p5 }
 0x256   : > { %p855_p0 = pneg %p854_p12 }
 0x257   : > { %p861_p2 = por %p860_p1, %p859_p11 }
 0x259   : > { %p862_p4 = pnand %p861_p2, %p855_p0 }
 0x25b   : > { %865 = shalt.err (!%p862_p4)
}
 0x25c   : > { %s919_s28 = smov 128   ;;  %s920_s18 = smov 8  }
 0x25d   : > { %680 = dma.vmem_to_hbm [thread:$0]  (%p1059_p6), %s1132_s20, 256, %s1137_s27, %s442_s22, %s919_s28, %s919_s28, %s920_s18  }
 0x25e PF: > { %p702_p8 = scmp.ge.s32.totalorder %s908_s15, 2  ;;  %s470_s29 = sand.u32 1, %s896_s12  }
 0x25f   : > { %p1198_p13 = scmp.ne.s32.totalorder %s1188_s19, 0  ;;  %s471_s30 = scalar_lea.sflag [#allocation4], %s470_s29 }
 0x261   : > { %p694_p3 = pnand %p702_p8, %p1198_p13 }
 0x263   : > { %891 = dma.done.wait (!%p694_p3), %s471_s30, 256  }
 0x264   : > { %893 = vsyncadd (!%p694_p3), %s471_s30, 4294967040  ;;  %p17_p7 = scmp.ge.s32.totalorder %s1046_s6, 5   ;;  %s1199_s12 = smov %s900_s13 }
 0x265   : > { %s1200_s13 = smov %s904_s14  ;;  %s1201_s14 = smov %s1055_s9 }
 0x266   : > { %s1202_s15 = smov %s1046_s6  ;;  %19 = sbr.rel (!%p17_p7) target bundleno = 6 (0x6), region = 85 }
 0x26d   :  { %476 = vsyncpa [#allocation3], 1 }
 0x26e   :  { %478 = vsyncpa [#allocation3 + $0x1], 1 }
 0x26f   :  { %479 = vsyncpa [#allocation6], 1 }
 0x270   :  { %480 = vsyncpa [#allocation4], 1 }
 0x271   :  { %482 = vsyncpa [#allocation4 + $0x1], 1 }

// kernel: tpu_custom_call.1
= control target key start
LH: loop header
LB: loop body
LE: loop exit
PB: predicated region body
PF: predicated region fallthrough
CT: control target
= control target key end

     0   :  { %8 = vsyncpa [#allocation3], 0  ;;  %s1180_s0 = inlined_call_operand.hbm [shape: f32[48,64], index: 0, kind: input, shape index: {}]   ;;  %s1181_s1 = inlined_call_operand.hbm [shape: f32[64,256], index: 1, kind: input, shape index: {}]   ;;  %s1182_s2 = inlined_call_operand.hbm [shape: f32[128,128], index: 2, kind: input, shape index: {}]   ;;  %s1183_s3 = inlined_call_operand.hbm [shape: f32[48,128], index: 3, kind: output, shape index: {}]  }
   0x1   :  { %10 = vsyncpa [#allocation3 + $0x1], 0 }
   0x2   :  { %11 = vsyncpa [#allocation6], 0 }
   0x3   :  { %12 = vsyncpa [#allocation4], 0 }
   0x4   :  { %14 = vsyncpa [#allocation4 + $0x1], 0  ;;  %s941_s12 = smov 0   ;;  %s943_s13 = smov 0  }
   0x5   :  { %s945_s14 = smov 0   ;;  %s947_s15 = smov 0  }
   0x6 LB: > { %s962_s16 = sadd.s32 4294967295, %s908_s15   ;;  %s547_s17 = sadd.s32 4294967294, %s908_s15   ;;  %s908_s15 = sphi %s947_s15, %s1202_s15   ;;  %s904_s14 = sphi %s945_s14, %s1201_s14   ;;  %s900_s13 = sphi %s943_s13, %s1200_s13   ;;  %s896_s12 = sphi %s941_s12, %s1199_s12  }
   0x7   : > { %p40_p0 = scmp.ne.s32.totalorder %s900_s13, %s896_s12  ;;  %p1184_p1 = scmp.eq.s32.totalorder %s962_s16, 0 }
   0x8   : > { %p112_p3 = scmp.eq.s32.totalorder %s547_s17, 2  ;;  %p548_p5 = scmp.ge.s32.totalorder %s908_s15, 1 }
   0x9   : > { %p971_p4 = por %p1184_p1, %p40_p0  ;;  %p119_p7 = scmp.lt.s32.totalorder %s908_s15, 4 }
   0xa   : > { %p976_p6 = por %p112_p3, %p40_p0  ;;  %s910_s21 = smov [#allocation5]  }
   0xb   : > { %s1187_s18 = scalar_select %p971_p4, 1, 0 }
   0xc   : > { %s1188_s19 = scalar_select %p976_p6, 1, 0 }
   0xd   : > { %p981_p8 = pnand %p548_p5, %p119_p7  ;;  %s131_s22 = sshll.u32 %s910_s21, 4  ;;  %s132_s22 = int_to_ptr.vmem [resolvable:$true] %s131_s22 }
   0xe   : > { %s911_s24 = smov [#allocation7]   ;;  %s752_s28 = scalar_lea.hbm %s1181_s1, 2048 }
   0xf   : > { %s1189_s20 = scalar_select %p981_p8, 1, 0 }
  0x10   : > { %p682_p9 = pneg %p981_p8  ;;  %s144_s25 = sshll.u32 %s911_s24, 4  ;;  %s993_s25 = int_to_ptr.vmem [resolvable:$true] %s144_s25 }
  0x11   : > { %p753_p11 = scmp.ne.s32.totalorder %s1181_s1, %s752_s28  ;;  %p759_p3 = scmp.lt.u32.totalorder %s752_s28, %s1181_s1 }
  0x12   : > { %p989_p10 = pnand %p682_p9, %p1184_p1 }
  0x14   : > { %p754_p12 = pneg %p989_p10 }
  0x16   : > { %p755_p13 = pnand %p754_p12, %p753_p11 }
  0x18   : > { %p756_p0 = pneg %p755_p13 }
  0x1a   : > { %p761_p5 = pnand %p759_p3, %p756_p0 }
  0x1c   : > { %764 = shalt.err (!%p761_p5)
}
  0x1d   : > { %s765_s6 = scalar_lea.vmem %s132_s22, 2048  ;;  %p773_p2 = scmp.lt.s32.totalorder %s132_s22, %s132_s22 }
  0x1e   : > { %p766_p7 = scmp.ne.s32.totalorder %s132_s22, %s765_s6  ;;  %p774_p6 = scmp.lt.s32.totalorder %s765_s6, %s765_s6 }
  0x20   : > { %p768_p9 = pnand %p766_p7, %p754_p12  ;;  %p775_p4 = por %p774_p6, %p773_p2 }
  0x22   : > { %p769_p1 = pneg %p768_p9 }
  0x24   : > { %p776_p8 = pnand %p775_p4, %p769_p1 }
  0x26   : > { %779 = shalt.err (!%p776_p8)
}
  0x27   : > { %s912_s7 = smov 256   ;;  %s913_s8 = smov 16  }
  0x28   : > { %685 = dma.hbm_to_vmem [thread:$0]  (!%p989_p10), %s1181_s1, 2048, %s132_s22, [#allocation6], %s912_s7, %s912_s7, %s913_s8  }
  0x29   : > { %s780_s21 = scalar_lea.hbm %s1182_s2, 2048 }
  0x2a   : > { %p781_p11 = scmp.ne.s32.totalorder %s1182_s2, %s780_s21  ;;  %p787_p4 = scmp.lt.u32.totalorder %s780_s21, %s1182_s2 }
  0x2c   : > { %p783_p1 = pnand %p781_p11, %p754_p12 }
  0x2e   : > { %p784_p2 = pneg %p783_p1 }
  0x30   : > { %p789_p6 = pnand %p787_p4, %p784_p2 }
  0x32   : > { %792 = shalt.err (!%p789_p6)
}
  0x33   : > { %s793_s22 = scalar_lea.vmem %s993_s25, 2048  ;;  %p801_p3 = scmp.lt.s32.totalorder %s993_s25, %s993_s25 }
  0x34   : > { %p794_p8 = scmp.ne.s32.totalorder %s993_s25, %s793_s22  ;;  %p802_p5 = scmp.lt.s32.totalorder %s793_s22, %s793_s22 }
  0x36   : > { %p796_p13 = pnand %p794_p8, %p754_p12  ;;  %p803_p7 = por %p802_p5, %p801_p3 }
  0x38   : > { %p797_p0 = pneg %p796_p13 }
  0x3a   : > { %p804_p9 = pnand %p803_p7, %p797_p0 }
  0x3c   : > { %807 = shalt.err (!%p804_p9)
}
  0x3d   : > { %s914_s29 = smov 128   ;;  %s915_s30 = smov 8  }
  0x3e   : > { %688 = dma.hbm_to_vmem [thread:$0]  (!%p989_p10), %s1182_s2, 2048, %s993_s25, [#allocation6], %s914_s29, %s914_s29, %s915_s30  }
  0x3f   : > { %s1046_s6 = sadd.s32 1, %s908_s15   ;;  %s27_s8 = sadd.s32 1, %s904_s14 }
  0x40   : > { %s24_s7 = ssub.s32 %s908_s15, %s1046_s6  ;;  %p34_p11 = scmp.ne.s32.totalorder %s904_s14, %s900_s13 }
  0x41   : > { %p25_p12 = scmp.eq.s32.totalorder %s24_s7, 0  ;;  %p35_p1 = scmp.eq.s32.totalorder %s908_s15, 0 }
  0x42   : > { %p1191_p4 = scmp.eq.s32.totalorder %s962_s16, 2  ;;  %p699_p8 = scmp.lt.s32.totalorder %s908_s15, 3 }
  0x43   : > { %s1055_s9 = scalar_select %p25_p12, %s904_s14, %s27_s8  }
  0x44   : > { %p36_p2 = por %p35_p1, %p34_p11  ;;  %p1059_p6 = por %p1191_p4, %p34_p11 }
  0x45   : > { %s158_s10 = sand.u32 1, %s904_s14   ;;  %s567_s25 = sshll.u32 %s908_s15, 8 }
  0x46   : > { %s552_s11 = sshll.u32 %s158_s10, 4  ;;  %s1069_s24 = scalar_lea.hbm %s1180_s0, %s567_s25 }
  0x47   : > { %s162_s26 = scalar_lea.vmem [#allocation2], %s552_s11  ;;  %p1073_p10 = pnand %p699_p8, %p36_p2 }
  0x48   : > { %s169_s27 = sshll.u32 %s162_s26, 4  ;;  %s1077_s22 = scalar_lea.sflag [#allocation3], %s158_s10  ;;  %s1071_s27 = int_to_ptr.vmem [resolvable:$true] %s169_s27 }
  0x49   : > { %s808_s4 = scalar_lea.hbm %s1069_s24, 256  ;;  %p810_p0 = pneg %p1073_p10 }
  0x4a   : > { %p809_p13 = scmp.ne.s32.totalorder %s1069_s24, %s808_s4  ;;  %s813_s8 = scalar_lea.hbm %s1180_s0, 768 }
  0x4b   : > { %p814_p7 = scmp.lt.u32.totalorder %s1069_s24, %s1180_s0  ;;  %p815_p9 = scmp.lt.u32.totalorder %s813_s8, %s808_s4 }
  0x4c   : > { %p811_p3 = pnand %p810_p0, %p809_p13  ;;  %p817_p11 = scmp.lt.u32.totalorder %s808_s4, %s1069_s24 }
  0x4d   : > { %p816_p12 = por %p815_p9, %p814_p7 }
  0x4e   : > { %p812_p5 = pneg %p811_p3 }
  0x4f   : > { %p818_p1 = por %p817_p11, %p816_p12 }
  0x51   : > { %p819_p2 = pnand %p818_p1, %p812_p5 }
  0x53   : > { %822 = shalt.err (!%p819_p2)
}
  0x54   : > { %s823_s10 = scalar_lea.vmem %s1071_s27, 256  ;;  %s916_s17 = smov [#allocation2]  }
  0x55   : > { %p824_p4 = scmp.ne.s32.totalorder %s1071_s27, %s823_s10  ;;  %s828_s21 = sshll.u32 %s916_s17, 4  ;;  %s829_s21 = int_to_ptr.vmem [resolvable:$false] %s828_s21 }
  0x56   : > { %s830_s26 = scalar_lea.vmem %s829_s21, 512  ;;  %p831_p3 = scmp.lt.s32.totalorder %s1071_s27, %s829_s21 }
  0x57   : > { %p826_p8 = pnand %p824_p4, %p810_p0  ;;  %p832_p7 = scmp.lt.s32.totalorder %s830_s26, %s823_s10 }
  0x59   : > { %p827_p13 = pneg %p826_p8  ;;  %p833_p9 = por %p832_p7, %p831_p3 }
  0x5b   : > { %p834_p12 = pnand %p833_p9, %p827_p13 }
  0x5d   : > { %837 = shalt.err (!%p834_p12)
}
  0x5e   : > { %692 = dma.hbm_to_vmem [thread:$0]  (!%p1073_p10), %s1069_s24, 256, %s1071_s27, %s1077_s22, %s914_s29, %s914_s29, %s915_s30  }
  0x5f   : > { %p1194_p0 = scmp.ne.s32.totalorder %s1189_s20, 0 }
  0x60   : > { %s1111_s4 = sand.u32 (!%p1194_p0), 1, %s900_s13   ;;  %p1195_p5 = scmp.ne.s32.totalorder (!%p1194_p0), %s1187_s18, 0 }
  0x61   : > { %181 = sbr.rel (%p1194_p0) target bundleno = 606 (0x25e), region = 32  ;;  %s556_s5 = sshll.u32 (!%p1194_p0), %s1111_s4, 4 }
  0x62   : > { %s184_s7 = scalar_lea.sflag (!%p1194_p0), [#allocation3], %s1111_s4  ;;  %s1117_s28 = scalar_lea.vmem (!%p1194_p0), [#allocation2], %s556_s5 }
  0x68   : > { %883 = dma.done.wait (%p1195_p5), %s184_s7, 256  }
  0x69   : > { %885 = vsyncadd (%p1195_p5), %s184_s7, 4294967040  ;;  %p1196_p10 = scmp.eq.s32.totalorder %s962_s16, 0 }
  0x6b   : > { %887 = dma.done.wait (%p1196_p10), [#allocation6], 4096   ;;  %p1197_p11 = pmov %p1196_p10 }
  0x6c   : > { %v917_v0 = vmov 0.0   ;;  %v223_v1 = vld [vmem:[#allocation5 + $0x8] sm:$0xff]  ;;  %v225_v2 = vld [vmem:[#allocation5 + $0x18] sm:$0xff]  ;;  %v222_v3 = vld [vmem:[#allocation5] sm:$0xff]  ;;  %vm238_vm0 = vcmask 523264   ;;  %s217_s18 = scalar_lea.vmem [#allocation8], %s556_s5 }
  0x6d   : > { %889 = vsyncadd (%p1197_p11), [#allocation6], 4294963200  ;;  %309 = vmatprep.mubr.f32.mxu0 %v917_v0  ;;  %v622_v4 = vpack.c.bf16 %v225_v2, %v223_v1  ;;  %v224_v5 = vld [vmem:[#allocation5 + $0x10] sm:$0xff]  ;;  %v227_v6 = vld [vmem:[#allocation5 + $0x28] sm:$0xff]  ;;  %s455_s20 = sshll.u32 %s217_s18, 4  ;;  %s568_s29 = sshll.u32 %s962_s16, 8  ;;  %s1132_s20 = int_to_ptr.vmem [resolvable:$true] %s455_s20 }
  0x6e   : > { %v229_v7 = vld [vmem:[#allocation5 + $0x38] sm:$0xff]  ;;  %v624_v8 = vpack.c.bf16 %v224_v5, %v222_v3  ;;  %v226_v10 = vld [vmem:[#allocation5 + $0x20] sm:$0xff]  ;;  %v228_v11 = vld [vmem:[#allocation5 + $0x30] sm:$0xff]  ;;  %s1137_s27 = scalar_lea.hbm %s1183_s3, %s568_s29  ;;  %s442_s22 = scalar_lea.sflag [#allocation4], %s1111_s4 }
  0x6f   : > { %v626_v9 = vpack.c.bf16 %v229_v7, %v227_v6  ;;  %v231_v12 = vld [vmem:[#allocation5 + $0x48] sm:$0xff]  ;;  %623 = vmatprep.subr.bf16.mxu0 %v622_v4  ;;  %v233_v13 = vld [vmem:[#allocation5 + $0x58] sm:$0xff]  ;;  %v628_v14 = vpack.c.bf16 %v228_v11, %v226_v10  ;;  %v230_v15 = vld [vmem:[#allocation5 + $0x40] sm:$0xff]  ;;  %s838_s8 = scalar_lea.vmem %s1132_s20, 256  ;;  %s918_s16 = smov [#allocation8]  }
  0x70   : > { %625 = vmatpush1.bf16.msra.mxu0 %v624_v8  ;;  %v630_v16 = vpack.c.bf16 %v233_v13, %v231_v12  ;;  %v232_v17 = vld [vmem:[#allocation5 + $0x50] sm:$0xff]  ;;  %v235_v18 = vld [vmem:[#allocation5 + $0x68] sm:$0xff]  ;;  %v237_v19 = vld [vmem:[#allocation5 + $0x78] sm:$0xff]  ;;  %p839_p1 = scmp.ne.s32.totalorder %s1132_s20, %s838_s8  ;;  %s842_s11 = sshll.u32 %s918_s16, 4  ;;  %s843_s11 = int_to_ptr.vmem [resolvable:$false] %s842_s11 }
  0x71   : > { %627 = vmatprep.subr.bf16.mxu0 %v626_v9  ;;  %v342_v20 = vld [vmem:[#allocation7] sm:$0xff]  ;;  %v343_v21 = vld [vmem:[#allocation7 + $0x8] sm:$0xff]  ;;  %v344_v22 = vld [vmem:[#allocation7 + $0x10] sm:$0xff]  ;;  %v632_v25 = vpack.c.bf16 %v232_v17, %v230_v15  ;;  %v634_v27 = vpack.c.bf16 %v237_v19, %v235_v18  ;;  %s844_s25 = scalar_lea.vmem %s843_s11, 512  ;;  %p845_p8 = scmp.lt.s32.totalorder %s1132_s20, %s843_s11 }
  0x72   : > { %v638_v23 = vpack.c.bf16 %v343_v21, %v342_v20  ;;  %v345_v24 = vld [vmem:[#allocation7 + $0x18] sm:$0xff]  ;;  %v234_v28 = vld [vmem:[#allocation5 + $0x60] sm:$0xff]  ;;  %v236_v29 = vld [vmem:[#allocation5 + $0x70] sm:$0xff]  ;;  %p840_p2 = pnand %p839_p1, %p1059_p6  ;;  %p846_p13 = scmp.lt.s32.totalorder %s844_s25, %s838_s8 }
  0x73   : > { %v642_v26 = vpack.c.bf16 %v345_v24, %v344_v22  ;;  %v636_v30 = vpack.c.bf16 %v236_v29, %v234_v28  ;;  %v220_v31 = vld [vmem:[%s1117_s28] sm:$0xff]  ;;  %v221_v32 = vld [vmem:[%s1117_s28 + $0x8] sm:$0xff] }
  0x74   : > { %629 = vmatpush1.bf16.msra.mxu0 %v628_v14  ;;  %639 = vmatprep.subr.bf16.mxu1 %v638_v23  ;;  %v346_v33 = vld [vmem:[#allocation7 + $0x20] sm:$0xff]  ;;  %v347_v34 = vld [vmem:[#allocation7 + $0x28] sm:$0xff]  ;;  %v348_v36 = vld [vmem:[#allocation7 + $0x30] sm:$0xff]  ;;  %p841_p4 = pneg %p840_p2  ;;  %p847_p3 = por %p846_p13, %p845_p8 }
  0x75   : > { %631 = vmatprep.subr.bf16.mxu0 %v630_v16  ;;  %641 = vmatpush3.bf16.msra.mxu1 %v638_v23  ;;  %v646_v35 = vpack.c.bf16 %v347_v34, %v346_v33  ;;  %v349_v37 = vld [vmem:[#allocation7 + $0x38] sm:$0xff]  ;;  %v350_v39 = vld [vmem:[#allocation7 + $0x40] sm:$0xff]  ;;  %v351_v40 = vld [vmem:[#allocation7 + $0x48] sm:$0xff] }
  0x76   : > { %643 = vmatprep.subr.bf16.mxu1 %v642_v26  ;;  %v650_v38 = vpack.c.bf16 %v349_v37, %v348_v36  ;;  %v654_v41 = vpack.c.bf16 %v351_v40, %v350_v39  ;;  %v352_v42 = vld [vmem:[#allocation7 + $0x50] sm:$0xff]  ;;  %v353_v43 = vld [vmem:[#allocation7 + $0x58] sm:$0xff]  ;;  %v354_v44 = vld [vmem:[#allocation7 + $0x60] sm:$0xff]  ;;  %p848_p7 = pnand %p847_p3, %p841_p4 }
  0x77   : > { %v658_v45 = vpack.c.bf16 %v353_v43, %v352_v42  ;;  %v355_v46 = vld [vmem:[#allocation7 + $0x68] sm:$0xff]  ;;  %v356_v48 = vld [vmem:[#allocation7 + $0x70] sm:$0xff]  ;;  %v357_v49 = vld [vmem:[#allocation7 + $0x78] sm:$0xff] }
  0x78   : > { %633 = vmatpush1.bf16.msra.mxu0 %v632_v25  ;;  %v662_v47 = vpack.c.bf16 %v355_v46, %v354_v44  ;;  %v666_v50 = vpack.c.bf16 %v357_v49, %v356_v48 }
  0x79   : > { %635 = vmatprep.subr.bf16.mxu0 %v634_v27  ;;  %645 = vmatpush3.bf16.msra.mxu1 %v642_v26 }
  0x7a   : > { %647 = vmatprep.subr.bf16.mxu1 %v646_v35 }
  0x7c   : > { %637 = vmatpush1.bf16.msra.mxu0 %v636_v30 }
  0x7d   : > { %649 = vmatpush3.bf16.msra.mxu1 %v646_v35 }
  0x7e   : > { %651 = vmatprep.subr.bf16.mxu1 %v650_v38 }
  0x7f   : > { %560 = vmatmul.mubr.msk.f32.vlgmr.msra.gmra.mrb[0].mxu0 %vm238_vm0, %v220_v31 }
  0x80   : > { %315 = vmatprep.mubr.f32.mxu0 %v917_v0 }
  0x81   : > { %653 = vmatpush3.bf16.msra.mxu1 %v650_v38 }
  0x82   : > { %655 = vmatprep.subr.bf16.mxu1 %v654_v41 }
  0x83   : > { %561 = vmatmul.mubr.msk.f32.gmra.mrb[2].mxu0 %vm238_vm0, %v221_v32 }
  0x85   : > { %657 = vmatpush3.bf16.msra.mxu1 %v654_v41 }
  0x86   : > { %659 = vmatprep.subr.bf16.mxu1 %v658_v45 }
  0x89   : > { %661 = vmatpush3.bf16.msra.mxu1 %v658_v45 }
  0x8a   : > { %663 = vmatprep.subr.bf16.mxu1 %v662_v47 }
  0x8d   : > { %665 = vmatpush3.bf16.msra.mxu1 %v662_v47 }
  0x8e   : > { %667 = vmatprep.subr.bf16.mxu1 %v666_v50 }
  0x91   : > { %669 = vmatpush3.bf16.msra.mxu1 %v666_v50 }
 0x152   : > { %v311_v51 = vpop.f32.mrb[0].mxu0 }
 0x153   : > { %v322_v52 = vmul.f32 %v311_v51, %v311_v51  ;;  %v313_v53 = vpop.f32.mrb[1].mxu0 }
 0x154   : > { %v324_v54 = vmul.f32 %v313_v53, %v313_v53 }
 0x156   : > { %v326_v55 = vadd.f32 %v324_v54, %v322_v52  ;;  %v317_v56 = vpop.f32.mrb[2].mxu0 }
 0x157   : > { %v323_v57 = vmul.f32 %v317_v56, %v317_v56  ;;  %v319_v58 = vpop.f32.mrb[3].mxu0 }
 0x158   : > { %v325_v59 = vmul.f32 %v319_v58, %v319_v58  ;;  %744 = vrsqrt.f32 %v326_v55  ;;  %vm330_vm1 = vcmp.eq.f32.partialorder %v326_v55, inf  ;;  %v333_v63 = vand.u32 2147483648, %v326_v55 }
 0x159   : > { %vm332_vm2 = vcmp.eq.f32.partialorder %v326_v55, 0.0 }
 0x15a   : > { %v327_v60 = vadd.f32 %v325_v59, %v323_v57 }
 0x15c   : > { %746 = vrsqrt.f32 %v327_v60  ;;  %vm337_vm3 = vcmp.eq.f32.partialorder %v327_v60, inf  ;;  %v340_v4 = vand.u32 2147483648, %v327_v60  ;;  %vm339_vm4 = vcmp.eq.f32.partialorder %v327_v60, 0.0 }
 0x162   : > { %v745_v61 = vpop.eup %744 }
 0x163   : > { %v329_v62 = vmul.f32 %v745_v61, %v326_v55 }
 0x165   : > { %v331_v0 = vsel %vm330_vm1, %v326_v55, %v329_v62 }
 0x166   : > { %v747_v1 = vpop.eup %746  ;;  %v334_v2 = vsel %vm332_vm2, %v333_v63, %v331_v0 }
 0x167   : > { %619 = vmatprep.mubr.f32.mxu1 %v334_v2  ;;  %v336_v3 = vmul.f32 %v747_v1, %v327_v60 }
 0x169   : > { %v338_v5 = vsel %vm337_vm3, %v327_v60, %v336_v3 }
 0x16a   : > { %v341_v6 = vsel %vm339_vm4, %v340_v4, %v338_v5 }
 0x16b   : > { %620 = vmatmul.mubr.f32.vlgmr.msra.gmra.mrb[0].mxu1 %v341_v6 }
 0x23e   : > { %v621_v7 = vpop.f32.mrb[0].mxu1 }
 0x23f   : > { %v434_v8 = vmax.f32 %v621_v7, 1e-05  ;;  %v424_v9 = vpop.f32.mrb[1].mxu1 }
 0x240   : > { %v433_v10 = vmax.f32 %v424_v9, 1e-05 }
 0x241   : > { %748 = vlog2.f32 %v434_v8 }
 0x242   : > { %750 = vlog2.f32 %v433_v10 }
 0x24b   : > { %v749_v11 = vpop.eup %748 }
 0x24c   : > { %v751_v12 = vpop.eup %750  ;;  %v438_v13 = vmul.f32 0.6931472, %v749_v11 }
 0x24d   : > { %v436_v14 = vmul.f32 0.6931472, %v751_v12 }
 0x24e   : > { %440 = vst [vmem:[%s217_s18 + $0x8] sm:$0xff] %v438_v13 }
 0x24f   : > { %439 = vst [vmem:[%s217_s18] sm:$0xff] %v436_v14 }
 0x250   : > { %851 = shalt.err (!%p848_p7)
}
 0x251   : > { %s852_s10 = scalar_lea.hbm %s1137_s27, 256  ;;  %s856_s26 = scalar_lea.hbm %s1183_s3, 768 }
 0x252   : > { %p853_p9 = scmp.ne.s32.totalorder %s1137_s27, %s852_s10  ;;  %p857_p5 = scmp.lt.u32.totalorder %s1137_s27, %s1183_s3 }
 0x253   : > { %p858_p10 = scmp.lt.u32.totalorder %s856_s26, %s852_s10  ;;  %p860_p1 = scmp.lt.u32.totalorder %s852_s10, %s1137_s27 }
 0x254   : > { %p854_p12 = pnand %p853_p9, %p1059_p6 }
 0x255   : > { %p859_p11 = por %p858_p10, %p857_p5 }
 0x256   : > { %p855_p0 = pneg %p854_p12 }
 0x257   : > { %p861_p2 = por %p860_p1, %p859_p11 }
 0x259   : > { %p862_p4 = pnand %p861_p2, %p855_p0 }
 0x25b   : > { %865 = shalt.err (!%p862_p4)
}
 0x25c   : > { %s919_s28 = smov 128   ;;  %s920_s18 = smov 8  }
 0x25d   : > { %680 = dma.vmem_to_hbm [thread:$0]  (%p1059_p6), %s1132_s20, 256, %s1137_s27, %s442_s22, %s919_s28, %s919_s28, %s920_s18  }
 0x25e PF: > { %p702_p8 = scmp.ge.s32.totalorder %s908_s15, 2  ;;  %s470_s29 = sand.u32 1, %s896_s12  }
 0x25f   : > { %p1198_p13 = scmp.ne.s32.totalorder %s1188_s19, 0  ;;  %s471_s30 = scalar_lea.sflag [#allocation4], %s470_s29 }
 0x261   : > { %p694_p3 = pnand %p702_p8, %p1198_p13 }
 0x263   : > { %891 = dma.done.wait (!%p694_p3), %s471_s30, 256  }
 0x264   : > { %893 = vsyncadd (!%p694_p3), %s471_s30, 4294967040  ;;  %p17_p7 = scmp.ge.s32.totalorder %s1046_s6, 5   ;;  %s1199_s12 = smov %s900_s13 }
 0x265   : > { %s1200_s13 = smov %s904_s14  ;;  %s1201_s14 = smov %s1055_s9 }
 0x266   : > { %s1202_s15 = smov %s1046_s6  ;;  %19 = sbr.rel (!%p17_p7) target bundleno = 6 (0x6), region = 85 }
 0x26d   :  { %476 = vsyncpa [#allocation3], 1 }
 0x26e   :  { %478 = vsyncpa [#allocation3 + $0x1], 1 }
 0x26f   :  { %479 = vsyncpa [#allocation6], 1 }
 0x270   :  { %480 = vsyncpa [#allocation4], 1 }
 0x271   :  { %482 = vsyncpa [#allocation4 + $0x1], 1 }

</bundles_post_ra>
